<compile_context>
chip_gen: v7x
topology: tpu7x:2x2x1
jax: 0.10.0
libtpu: 0.0.40
codegen_flags: <defaults>
</compile_context>

<pallas_src>
import functools

import jax
import jax.numpy as jnp
from jax.experimental import pallas as pl
from jax.experimental.pallas import tpu as pltpu


def _round_up(x, m):
    return ((x + m - 1) // m) * m


# ----------------------------------------------------------------------------
# Pallas kernel: per-(sample, HW-tile) dynamic-weight conv as a single matmul.
# Filter attention is already folded into the weight, so the epilogue is just
# an MXU-pop + lane-dense store.
# ----------------------------------------------------------------------------
def _tconv_matmul_kernel(w_ref, p_ref, o_ref):
    # w_ref: (O_pad, CKK_pad)   per-sample weight (filter att folded), bf16
    # p_ref: (CKK_pad, T_hw)    im2col patch tile, bf16
    # o_ref: (O_pad, T_hw)      output tile, f32  (lane dim = T_hw, 128-dense)
    acc = jnp.dot(w_ref[...], p_ref[...], preferred_element_type=jnp.float32)
    o_ref[...] = acc.astype(o_ref.dtype)


def _dynamic_conv_pallas(wmat, patches, *, tile_hw):
    """wmat: (B, O_pad, CKK_pad) bf16, patches: (B, CKK_pad, HW_pad) bf16."""
    B, O_pad, CKK_pad = wmat.shape
    _, _, HW_pad = patches.shape
    assert HW_pad % tile_hw == 0
    n_hw = HW_pad // tile_hw

    flops = 2 * B * O_pad * CKK_pad * HW_pad
    bytes_accessed = (B * O_pad * CKK_pad * 2          # weights (bf16)
                      + B * CKK_pad * HW_pad * 2       # patches (bf16)
                      + B * O_pad * HW_pad * 4)        # output  (f32)

    return pl.pallas_call(
        _tconv_matmul_kernel,
        out_shape=jax.ShapeDtypeStruct((B, O_pad, HW_pad), jnp.float32),
        grid=(B, n_hw),
        in_specs=[
            # weight block reused across all HW tiles of a sample
            pl.BlockSpec((pl.Squeezed(), O_pad, CKK_pad), lambda b, j: (b, 0, 0)),
            pl.BlockSpec((pl.Squeezed(), CKK_pad, tile_hw), lambda b, j: (b, 0, j)),
        ],
        out_specs=pl.BlockSpec((pl.Squeezed(), O_pad, tile_hw),
                               lambda b, j: (b, 0, j)),
        compiler_params=pltpu.CompilerParams(
            dimension_semantics=("parallel", "parallel")),
        cost_estimate=pl.CostEstimate(flops=flops, transcendentals=0,
                                      bytes_accessed=bytes_accessed),
    )(wmat, patches)


# ----------------------------------------------------------------------------
# Parameter construction (deterministic, mirrors the module's __init__ shapes)
# ----------------------------------------------------------------------------
def init_tconv2d_params(key, in_dim, out_dim, kernel_size,
                        num_kernels=4, reduction_ratio=0.0625, min_channels=16):
    reduced = max(int(in_dim * reduction_ratio), min_channels)
    ks = jax.random.split(key, 6)

    def kaiming(k, shape, fan_out):
        std = (2.0 / fan_out) ** 0.5
        return std * jax.random.normal(k, shape, dtype=jnp.float32)

    params = {
        # main bank of conv kernels: (N, O, C, k, k)
        "weight": kaiming(ks[0],
                          (num_kernels, out_dim, in_dim, kernel_size, kernel_size),
                          out_dim * kernel_size * kernel_size),
        # TAttention 1x1 convs stored as 2-D matrices (out, in); biases = 0
        "w_lin": kaiming(ks[1], (reduced, in_dim), reduced),
        "w_ch": kaiming(ks[2], (in_dim, reduced), in_dim),
        "b_ch": jnp.zeros((in_dim,), jnp.float32),
        "w_f": kaiming(ks[3], (out_dim, reduced), out_dim),
        "b_f": jnp.zeros((out_dim,), jnp.float32),
        "w_s": kaiming(ks[4], (kernel_size * kernel_size, reduced),
                       kernel_size * kernel_size),
        "b_s": jnp.zeros((kernel_size * kernel_size,), jnp.float32),
        "w_k": kaiming(ks[5], (num_kernels, reduced), num_kernels),
        "b_k": jnp.zeros((num_kernels,), jnp.float32),
    }
    return params


# ----------------------------------------------------------------------------
# Forward pass (glue in JAX, hot path in Pallas)
# ----------------------------------------------------------------------------
@functools.partial(jax.jit, static_argnames=(
    "kernel_size", "stride", "padding", "dilation", "out_dim",
    "num_kernels", "num_heads", "temperature"))
def tconv2d_forward(x, params, *, kernel_size, stride=1, padding=0, dilation=1,
                    out_dim=8, num_kernels=4, num_heads=1, temperature=1.0):
    assert num_heads == 1, "only num_heads=1 (default) is implemented"
    B, C, H, W = x.shape
    k = kernel_size

    # --- TAttention (tiny 1x1-conv heads on the pooled vector) --------------
    gap = jnp.mean(x, axis=(2, 3))                                  # (B, C)
    y = jnp.maximum(gap @ params["w_lin"].T, 0.0)                   # (B, reduced)
    ch_att = jax.nn.sigmoid((y @ params["w_ch"].T + params["b_ch"]) / temperature)   # (B, C)
    filt_att = jax.nn.sigmoid((y @ params["w_f"].T + params["b_f"]) / temperature)   # (B, O)
    s_att = jax.nn.sigmoid((y @ params["w_s"].T + params["b_s"]) / temperature)      # (B, k*k)
    k_att = jax.nn.softmax((y @ params["w_k"].T + params["b_k"]) / temperature, axis=1)  # (B, N)

    # --- aggregated per-sample weight, filter attention folded in -----------
    w = params["weight"]                                            # (N, O, C, k, k)
    aw = jnp.einsum("bn,nocij->bocij", k_att, w)
    aw = aw * s_att.reshape(B, 1, 1, k, k)
    wmat = aw.reshape(B, out_dim, C * k * k)                        # (B, O, CKK)
    wmat = wmat * filt_att[:, :, None]                              # fold (p@w)*f == p@(w*f)

    # --- channel attention on input, then im2col in (B, CKK, HW) layout -----
    xs = x * ch_att[:, :, None, None]
    x_pad = jnp.pad(xs, ((0, 0), (0, 0), (padding, padding), (padding, padding)))
    H_out = (H + 2 * padding - dilation * (k - 1) - 1) // stride + 1
    W_out = (W + 2 * padding - dilation * (k - 1) - 1) // stride + 1
    cols = []
    for kh in range(k):
        for kw in range(k):
            sl = x_pad[:, :,
                       kh * dilation: kh * dilation + (H_out - 1) * stride + 1: stride,
                       kw * dilation: kw * dilation + (W_out - 1) * stride + 1: stride]
            cols.append(sl)                                         # (B, C, Ho, Wo)
    patches = jnp.stack(cols, axis=2)                               # (B, C, k*k, Ho, Wo)
    patches = patches.reshape(B, C * k * k, H_out * W_out)          # (B, CKK, HW) - no transpose

    # --- pad operands to MXU / lane friendly shapes, cast to bf16 -----------
    CKK = C * k * k
    HW = H_out * W_out
    O = out_dim
    O_pad = _round_up(O, 8)                     # sublane-aligned output rows
    CKK_pad = _round_up(CKK, 128)               # full MXU contraction passes
    tile_hw = min(512, _round_up(HW, 128))      # lane-dense output tile
    HW_pad = _round_up(HW, tile_hw)

    wmat_p = jnp.pad(wmat.astype(jnp.bfloat16),
                     ((0, 0), (0, O_pad - O), (0, CKK_pad - CKK)))
    patches_p = jnp.pad(patches.astype(jnp.bfloat16),
                        ((0, 0), (0, CKK_pad - CKK), (0, HW_pad - HW)))

    # --- Pallas hot path: per-sample (O,CKK)@(CKK,HW) on the MXU -------------
    out = _dynamic_conv_pallas(wmat_p, patches_p, tile_hw=tile_hw)  # (B, O_pad, HW_pad) f32
    out = out[:, :O, :HW].reshape(B, O, H_out, W_out)               # free reshape to NCHW
    return out


# ----------------------------------------------------------------------------
if __name__ == "__main__":
    key = jax.random.PRNGKey(0)
    kx, kp = jax.random.split(key)

    # small shapes consistent with the module defaults
    B, C_in, C_out, H, W = 2, 4, 8, 16, 16
    kernel_size, stride, padding, dilation = 3, 1, 1, 1
    num_kernels, num_heads = 4, 1

    x = jax.random.normal(kx, (B, C_in, H, W), dtype=jnp.float32)
    params = init_tconv2d_params(kp, C_in, C_out, kernel_size,
                                 num_kernels=num_kernels)

    out = tconv2d_forward(
        x, params,
        kernel_size=kernel_size, stride=stride, padding=padding,
        dilation=dilation, out_dim=C_out, num_kernels=num_kernels,
        num_heads=num_heads, temperature=1.0)
    jax.block_until_ready(out)

    assert out.shape == (B, C_out, H, W), out.shape
    assert bool(jnp.all(jnp.isfinite(out)))
    print("KERNEL_OK")
</pallas_src>

<mosaic_0001>
module attributes {stable_mosaic.version = 11 : i64} {
  func.func @_tconv_matmul_kernel(%arg0: i32, %arg1: i32, %arg2: memref<1x8x128xbf16, #tpu.memory_space<vmem>>, %arg3: memref<1x128x256xbf16, #tpu.memory_space<vmem>>, %arg4: memref<1x8x256xf32, #tpu.memory_space<vmem>>) attributes {dimension_semantics = [#tpu.dimension_semantics<parallel>, #tpu.dimension_semantics<parallel>], iteration_bounds = array<i64: 2, 1>, scalar_prefetch = 0 : i64, scratch_operands = 0 : i64, tpu.core_type = #tpu.core_type<tc>, window_params = [{transform_indices = @transform_0, window_bounds = array<i64: 1, 8, 128>}, {transform_indices = @transform_1, window_bounds = array<i64: 1, 128, 256>}, {transform_indices = @transform_2, window_bounds = array<i64: 1, 8, 256>}]} {
    %c0 = arith.constant 0 : index
    %c0_0 = arith.constant 0 : index
    %c0_1 = arith.constant 0 : index
    %0 = vector.load %arg2[%c0, %c0_0, %c0_1] : memref<1x8x128xbf16, #tpu.memory_space<vmem>>, vector<1x8x128xbf16>
    %1 = vector.shape_cast %0 : vector<1x8x128xbf16> to vector<8x128xbf16>
    %c0_2 = arith.constant 0 : index
    %c0_3 = arith.constant 0 : index
    %c0_4 = arith.constant 0 : index
    %2 = vector.load %arg3[%c0_2, %c0_3, %c0_4] : memref<1x128x256xbf16, #tpu.memory_space<vmem>>, vector<1x128x256xbf16>
    %3 = vector.shape_cast %2 : vector<1x128x256xbf16> to vector<128x256xbf16>
    %cst = arith.constant dense<0.000000e+00> : vector<8x256xf32>
    %4 = tpu.matmul %1, %3, %cst {dimension_numbers = #tpu.dot_dimension_numbers<[1], [0], [0], [1], [0, 0, 1, 1], [], []>} : vector<8x128xbf16>, vector<128x256xbf16>, vector<8x256xf32> -> vector<8x256xf32>
    %c0_5 = arith.constant 0 : index
    %c0_6 = arith.constant 0 : index
    %c0_7 = arith.constant 0 : index
    %5 = vector.load %arg4[%c0_5, %c0_6, %c0_7] : memref<1x8x256xf32, #tpu.memory_space<vmem>>, vector<1x8x256xf32>
    %6 = vector.shape_cast %5 : vector<1x8x256xf32> to vector<8x256xf32>
    %7 = vector.shape_cast %4 : vector<8x256xf32> to vector<1x8x256xf32>
    tpu.vector_store %arg4[%c0_5, %c0_6, %c0_7], %7 {strides = array<i32>} : memref<1x8x256xf32, #tpu.memory_space<vmem>>, vector<1x8x256xf32>,
    return
  }
  func.func @transform_0(%arg0: i32, %arg1: i32) -> (i32, i32, i32) {
    %c0_i32 = arith.constant 0 : i32
    %c0_i32_0 = arith.constant 0 : i32
    %c0_i32_1 = arith.constant 0 : i32
    return %arg0, %c0_i32, %c0_i32_0 : i32, i32, i32
  }
  func.func @transform_1(%arg0: i32, %arg1: i32) -> (i32, i32, i32) {
    %c0_i32 = arith.constant 0 : i32
    %c0_i32_0 = arith.constant 0 : i32
    return %arg0, %c0_i32, %arg1 : i32, i32, i32
  }
  func.func @transform_2(%arg0: i32, %arg1: i32) -> (i32, i32, i32) {
    %c0_i32 = arith.constant 0 : i32
    %c0_i32_0 = arith.constant 0 : i32
    return %arg0, %c0_i32, %arg1 : i32, i32, i32
  }
}

</mosaic_0001>

<bundles_post_ra>
// kernel: mul.13
= control target key start
LH: loop header
LB: loop body
LE: loop exit
PB: predicated region body
PF: predicated region fallthrough
CT: control target
= control target key end

     0   :  { %vm7_vm0 = vcmask 23552   ;;  %s36_s8 = smov 122   ;;  %s56_s0 = inlined_call_operand.vmem [shape: f32[2,9], index: 0, kind: input, shape index: {}]   ;;  %s57_s1 = inlined_call_operand.vmem [shape: f32[2,3,3], index: 1, kind: output, shape index: {}]  }
   0x1   :  { %v4_v0 = vld [vmem:[%s56_s0] sm:$0x3]  ;;  %s35_s0 = smov 125  }
   0x2   :  { %5 = vst [vmem:[#allocation1] sm:$0x3] %v4_v0 }
   0x9   :  { %v9_v1 = vld [vmem:[#allocation1] sm:$0x3]  }
   0xa   :  { %v6_v2 = vld [vmem:[#allocation1] sm:$0x3]   ;;  %10 = vrot.lane.b32.xlu0 %v9_v1, %s35_s0 }
   0xb   :  { %8 = vst.msk [vmem:[#allocation0] ss:$8 sm:$0x3] %vm7_vm0, %v6_v2   ;;  %v15_v3 = vld [vmem:[#allocation1] sm:$0x3]  }
   0xe   :  { %16 = vrot.lane.b32.xlu0 %v15_v3, %s36_s8 }
  0x7c   :  { %v11_v4 = vpop.permute.xlu0 %10  }
  0x7d   :  { %14 = vst.msk [vmem:[#allocation0 + $0x1] ss:$8 sm:$0x3] %vm7_vm0, %v11_v4  }
  0x80   :  { %v17_v5 = vpop.permute.xlu0 %16  }
  0x81   :  { %20 = vst.msk [vmem:[#allocation0 + $0x2] ss:$8 sm:$0x3] %vm7_vm0, %v17_v5  }
  0x88   :  { %v24_v6 = vld [vmem:[#allocation0] sm:$0xf]  ;;  %v28_v7 = vld [vmem:[#allocation0 + $0x8] sm:$0xf] }
  0x89   :  { %26 = vst [vmem:[%s57_s1] sm:$0xf] %v24_v6  ;;  %32 = vst [vmem:[%s57_s1 + $0x4] sm:$0xf] %v28_v7 }

// kernel: tconv2d_forward.1
= control target key start
LH: loop header
LB: loop body
LE: loop exit
PB: predicated region body
PF: predicated region fallthrough
CT: control target
= control target key end

     0   :  { %s559_s9 = smov 0   ;;  %s561_s10 = smov 0   ;;  %s618_s0 = inlined_call_operand.vmem [shape: bf16[2,8,128], index: 0, kind: input, shape index: {}]   ;;  %s619_s1 = inlined_call_operand.vmem [shape: bf16[2,128,256], index: 1, kind: input, shape index: {}]   ;;  %s620_s2 = inlined_call_operand.vmem [shape: f32[2,8,256], index: 2, kind: output, shape index: {}]  }
   0x1   :  { %s563_s11 = smov 0  }
   0x2 LB: > { %s24_s12 = sadd.s32 1, %s537_s10  ;;  %p444_p0 = scmp.ge.s32.totalorder %s541_s11, 1  ;;  %s541_s11 = sphi %s563_s11, %s12_s11   ;;  %s537_s10 = sphi %s561_s10, %s622_s10   ;;  %s533_s9 = sphi %s559_s9, %s621_s9  }
   0x3   : > { %p26_p1 = scmp.ge.s32.totalorder %s24_s12, 2  ;;  %p142_p2 = scmp.lt.s32.totalorder %s541_s11, 3 }
   0x5   : > { %s624_s12 = smov (%p26_p1, %s24_s12), 0  ;;  %p143_p3 = pnand %p444_p0, %p142_p2 }
   0x6   : > { %p176_p4 = scmp.lt.s32.totalorder (!%p143_p3), %s533_s9, 1  ;;  %v543_v0 = vmov (!%p143_p3), 0  }
   0x7   : > { %146 = sbr.rel (%p143_p3) target bundleno = 265 (0x109), region = 28  ;;  %330 = vmatprep.mubr.bf16.mxu0 (!%p143_p3), %v543_v0 }
   0xe   : > { %s626_s9 = smov (!%p176_p4, %s533_s9), 1 }
   0xf   : > { %s468_s13 = sshll.u32 %s626_s9, 7  ;;  %s445_s17 = sshll.u32 %s626_s9, 2 }
  0x10   : > { %s583_s16 = scalar_lea.vmem %s619_s1, %s468_s13  ;;  %s179_s20 = scalar_lea.vmem %s618_s0, %s445_s17 }
  0x11   : > { %v495_v1 = vld [vmem:[%s583_s16 + $0x4] ss:$8 sps:$4 sm:$0xff]   ;;  %v497_v2 = vld [vmem:[%s583_s16] ss:$8 sps:$4 sm:$0xff]   ;;  %v498_v3 = vld [vmem:[%s583_s16 + $0x14] ss:$8 sps:$4 sm:$0xff]  }
  0x12   : > { %298 = vmatprep.subr.bf16.mxu0 %v495_v1  ;;  %v500_v4 = vld [vmem:[%s583_s16 + $0x10] ss:$8 sps:$4 sm:$0xff]   ;;  %v501_v5 = vld [vmem:[%s583_s16 + $0x24] ss:$8 sps:$4 sm:$0xff]   ;;  %v503_v6 = vld [vmem:[%s583_s16 + $0x20] ss:$8 sps:$4 sm:$0xff]  }
  0x13   : > { %299 = vmatpush1.bf16.msra.mxu0 %v497_v2  ;;  %v504_v7 = vld [vmem:[%s583_s16 + $0x34] ss:$8 sps:$4 sm:$0xff]   ;;  %v506_v8 = vld [vmem:[%s583_s16 + $0x30] ss:$8 sps:$4 sm:$0xff]   ;;  %v507_v9 = vld [vmem:[%s583_s16 + $0x44] ss:$8 sps:$4 sm:$0xff]  }
  0x14   : > { %300 = vmatprep.subr.bf16.mxu0 %v498_v3  ;;  %v509_v10 = vld [vmem:[%s583_s16 + $0x40] ss:$8 sps:$4 sm:$0xff]   ;;  %v510_v11 = vld [vmem:[%s583_s16 + $0x54] ss:$8 sps:$4 sm:$0xff]   ;;  %v512_v12 = vld [vmem:[%s583_s16 + $0x50] ss:$8 sps:$4 sm:$0xff]  }
  0x15   : > { %v513_v13 = vld [vmem:[%s583_s16 + $0x64] ss:$8 sps:$4 sm:$0xff]   ;;  %v515_v14 = vld [vmem:[%s583_s16 + $0x60] ss:$8 sps:$4 sm:$0xff]   ;;  %v516_v15 = vld [vmem:[%s583_s16 + $0x74] ss:$8 sps:$4 sm:$0xff]  }
  0x16   : > { %v518_v16 = vld [vmem:[%s583_s16 + $0x70] ss:$8 sps:$4 sm:$0xff]   ;;  %v201_v17 = vld [vmem:[%s179_s20] sm:$0xf]  ;;  %s469_s21 = sshll.u32 %s626_s9, 4 }
  0x17   : > { %301 = vmatpush1.bf16.msra.mxu0 %v500_v4  ;;  %s198_s24 = scalar_lea.vmem %s620_s2, %s469_s21 }
  0x18   : > { %302 = vmatprep.subr.bf16.mxu0 %v501_v5 }
  0x1b   : > { %303 = vmatpush1.bf16.msra.mxu0 %v503_v6 }
  0x1c   : > { %304 = vmatprep.subr.bf16.mxu0 %v504_v7 }
  0x1f   : > { %305 = vmatpush1.bf16.msra.mxu0 %v506_v8 }
  0x20   : > { %306 = vmatprep.subr.bf16.mxu0 %v507_v9 }
  0x23   : > { %307 = vmatpush1.bf16.msra.mxu0 %v509_v10 }
  0x24   : > { %308 = vmatprep.subr.bf16.mxu0 %v510_v11 }
  0x27   : > { %309 = vmatpush1.bf16.msra.mxu0 %v512_v12 }
  0x28   : > { %310 = vmatprep.subr.bf16.mxu0 %v513_v13 }
  0x2b   : > { %311 = vmatpush1.bf16.msra.mxu0 %v515_v14 }
  0x2c   : > { %312 = vmatprep.subr.bf16.mxu0 %v516_v15 }
  0x2f   : > { %313 = vmatpush1.bf16.msra.mxu0 %v518_v16 }
  0x32   : > { %331 = vmatmul.mubr.bf16.vlgmr.msra.gmra.mrb[0].mxu0 %v201_v17 }
 0x105   : > { %v332_v18 = vpop.f32.mrb[0].mxu0 }
 0x106   : > { %339 = vst [vmem:[%s198_s24] sm:$0xff] %v332_v18  ;;  %v334_v19 = vpop.f32.mrb[1].mxu0 }
 0x107   : > { %340 = vst [vmem:[%s198_s24 + $0x8] sm:$0xff] %v334_v19  ;;  %v336_v20 = vpop.f32.mrb[2].mxu0 }
 0x108   : > { %v337_v21 = vpop.f32.mrb[3].mxu0 }
 0x109 PF: > { %s12_s11 = sadd.s32 1, %s541_s11   ;;  %s621_s9 = smov %s537_s10 }
 0x10a   : > { %p9_p5 = scmp.ge.s32.totalorder %s12_s11, 4   ;;  %s622_s10 = smov %s624_s12 }
 0x10c   :  { %11 = sbr.rel (!%p9_p5) target bundleno = 2 (0x2), region = 61 }

</bundles_post_ra>
